<compile_context>
chip_gen: v7x
topology: tpu7x:2x2x1
jax: 0.10.0
libtpu: 0.0.40
codegen_flags: <defaults>
</compile_context>

<pallas_src>
import math
import jax
import jax.numpy as jnp
from jax.experimental import pallas as pl
from jax.experimental.pallas import tpu as pltpu

# ---------------------------------------------------------------------------
# Winograd F(2x2, 3x3) transform matrices (= wincnn.cookToomFilter((0,1,-1),2,3))
# ---------------------------------------------------------------------------
G = jnp.array([[1.0, 0.0, 0.0],
               [0.5, 0.5, 0.5],
               [0.5, -0.5, 0.5],
               [0.0, 0.0, 1.0]], dtype=jnp.float32)
G_T = G.T

# Integer-valued transform matrices, used as unrolled +-1 add/sub weights
# inside the kernel (B_T and A_T contain only {0, 1, -1}).
_BT = ((1, 0, -1, 0),
       (0, 1, 1, 0),
       (0, -1, 1, 0),
       (0, 1, 0, -1))
_AT = ((1, 1, 1, 0),
       (0, 1, -1, -1))

_A = 4                      # Winograd input-tile size (m + r - 1)
_M = 2                      # output-tile size
_K_TILE_MAX = 256           # K tile (full MXU feed on v6e/v7x; 2 passes on v5e)
_VMEM_BUDGET = 40 << 20     # per-step VMEM budget; fits v7x's 64 MiB physical


def _round_up(x, n):
    return ((x + n - 1) // n) * n


def _pad_dim(d):
    # 128-aligned when large (lane-dense U / full MXU contraction feed),
    # 16-aligned when small (bf16 sublane packing) to avoid inflating D.
    return _round_up(d, 128) if d >= 128 else _round_up(d, 16)


def _block_vmem_bytes(kt, cp, pt):
    """Rough per-grid-step VMEM footprint (double-buffered blocks + temps)."""
    u_blk = 16 * kt * cp * 2            # bf16 transformed filters
    d_blk = 16 * cp * pt * 2            # bf16 raw tile slabs
    y_blk = 4 * kt * pt * 4             # f32 output slabs
    temps = 5 * cp * pt * 4 + cp * pt * 2 + 7 * kt * pt * 4
    return 2 * (u_blk + d_blk + y_blk) + temps


def _choose_k_tile(Kp):
    if Kp % 256 == 0:
        return min(Kp, _K_TILE_MAX)
    if Kp % 128 == 0:
        return 128
    return Kp                            # Kp < 128 (multiple of 16)


def _choose_tiles(Kp, Cp, P):
    P128 = _round_up(P, 128)
    kt = _choose_k_tile(Kp)
    pt = min(128, P128)
    for cand in (1024, 512, 256, 128):
        c = min(cand, P128)
        if _block_vmem_bytes(kt, Cp, c) <= _VMEM_BUDGET:
            pt = c
            break
    else:
        # Shrink K tile as a last resort (very large C).
        kt = 128 if Kp % 128 == 0 else Kp
    limit = min(max(int(1.5 * _block_vmem_bytes(kt, Cp, pt)), 8 << 20), 96 << 20)
    return kt, pt, limit


# ---------------------------------------------------------------------------
# Fused Pallas kernel: input transform + 16 channel-GEMMs + output transform.
#   u_ref: (16, Kt, Cp)  bf16 transformed filters for this K tile
#   d_ref: (16, Cp, Pt)  bf16 raw 4x4 input-tile slabs for this P tile
#   y_ref: ( 4, Kt, Pt)  f32  2x2 output-tile slabs
# ---------------------------------------------------------------------------
def winograd_fused_kernel(u_ref, d_ref, y_ref):
    acc = [[None, None], [None, None]]          # 2x2 output accumulators (f32)
    for i in range(_A):
        # Row transform: tmp[q] = sum_p B_T[i, p] * d[p, q]  (f32 adds/subs)
        tmp = []
        for q in range(_A):
            s = None
            for p in range(_A):
                w = _BT[i][p]
                if w == 0:
                    continue
                term = d_ref[p * _A + q].astype(jnp.float32)     # (Cp, Pt)
                term = term if w == 1 else -term
                s = term if s is None else s + term
            tmp.append(s)
        # Separable output transform: first reduce over j into Z[no].
        z = [None, None]
        for j in range(_A):
            # Column transform: v = sum_q B_T[j, q] * tmp[q]
            v = None
            for q in range(_A):
                w = _BT[j][q]
                if w == 0:
                    continue
                term = tmp[q] if w == 1 else -tmp[q]
                v = term if v is None else v + term
            # Channel reduction on the MXU (bf16 x bf16 -> f32 accumulate).
            m_ij = jnp.dot(u_ref[i * _A + j], v.astype(jnp.bfloat16),
                           preferred_element_type=jnp.float32)    # (Kt, Pt)
            for no in range(_M):
                wj = _AT[no][j]
                if wj == 0:
                    continue
                term = m_ij if wj == 1 else -m_ij
                z[no] = term if z[no] is None else z[no] + term
        # Then accumulate over i into the 2x2 output positions.
        for mo in range(_M):
            wi = _AT[mo][i]
            if wi == 0:
                continue
            for no in range(_M):
                term = z[no] if wi == 1 else -z[no]
                acc[mo][no] = term if acc[mo][no] is None else acc[mo][no] + term
    for mo in range(_M):
        for no in range(_M):
            y_ref[mo * _M + no] = acc[mo][no]


def _winograd_gemm_fused(U_p, D_p, Kt, Pt, vmem_limit):
    """U_p: (16, Kp, Cp) bf16; D_p: (16, Cp, Pp) bf16 -> (4, Kp, Pp) f32."""
    nt, Kp, Cp = U_p.shape
    _, _, Pp = D_p.shape
    grid = (Pp // Pt, Kp // Kt)          # k innermost: D not re-DMA'd across K
    return pl.pallas_call(
        winograd_fused_kernel,
        out_shape=jax.ShapeDtypeStruct((_M * _M, Kp, Pp), jnp.float32),
        grid=grid,
        in_specs=[
            # U: index only depends on the K tile -> small, stays near-resident.
            pl.BlockSpec((nt, Kt, Cp), lambda pb, kb: (0, kb, 0)),
            # D: wide lane-dense P tiles; independent of k.
            pl.BlockSpec((nt, Cp, Pt), lambda pb, kb: (0, 0, pb)),
        ],
        out_specs=pl.BlockSpec((_M * _M, Kt, Pt), lambda pb, kb: (0, kb, pb)),
        compiler_params=pltpu.CompilerParams(
            dimension_semantics=("parallel", "parallel"),
            vmem_limit_bytes=int(vmem_limit)),
    )(U_p, D_p)


# ---------------------------------------------------------------------------
# Full Winograd forward (mirrors the PyTorch module's forward()).
# ---------------------------------------------------------------------------
def winograd_conv2d(x, filt):
    N, C, H, W = x.shape
    K, Ck, r, _ = filt.shape
    assert Ck == C and r == 3 and H == W
    assert H >= 4 and H % 2 == 0, "Only input for perfect tiling is supported."

    a = _M + r - 1               # 4
    overlap = r - 1              # 2
    T = (W - a) // overlap + 1
    P = N * T * T
    out_size = H - r + 1

    Kp = _pad_dim(K)
    Cp = _pad_dim(C)
    Kt, Pt, vmem_limit = _choose_tiles(Kp, Cp, P)
    Pp = _round_up(P, Pt)

    # --- filter transform U = G f G^T, emitted directly in (a*a, K, C) ------
    U_pos = jnp.einsum('ij,kcjl,lm->imkc', G, filt, G_T).reshape(a * a, K, C)
    U_p = jnp.pad(U_pos, ((0, 0), (0, Kp - K), (0, Cp - C))).astype(jnp.bfloat16)

    # --- raw 4x4 tile extraction via 16 strided slices (no gather), bf16 ----
    # Pad the channel axis of x *before* slicing so the tile slabs come out at
    # Cp directly; only the small P tail pad remains afterwards.
    x_bf = x.astype(jnp.bfloat16)
    x_t = jnp.transpose(x_bf, (1, 0, 2, 3))                  # (C, N, H, W)
    x_t = jnp.pad(x_t, ((0, Cp - C), (0, 0), (0, 0), (0, 0)))
    slabs = []
    for p in range(a):
        for q in range(a):
            s = jax.lax.slice(x_t,
                              (0, 0, p, q),
                              (Cp, N, p + 2 * (T - 1) + 1, q + 2 * (T - 1) + 1),
                              (1, 1, overlap, overlap))      # (Cp, N, T, T)
            slabs.append(s)
    # b = n*T*T + tH*T + tW ordering, matching the reference forward()
    D_pos = jnp.stack(slabs, axis=0).reshape(a * a, Cp, P)   # (16, Cp, P) bf16
    D_p = jnp.pad(D_pos, ((0, 0), (0, 0), (0, Pp - P)))

    # --- fused transform + channel GEMM + output transform (Pallas) ---------
    Y4 = _winograd_gemm_fused(U_p, D_p, Kt, Pt, vmem_limit)  # (4, Kp, Pp)
    Y4 = Y4[:, :K, :P]                                       # (4, K, P)

    # --- scatter the 2x2 tiles back to the NCHW output image ----------------
    Yt = Y4.reshape(_M, _M, K, N, T, T)                      # (mo, no, K, N, tH, tW)
    Y = jnp.transpose(Yt, (3, 2, 4, 0, 5, 1)).reshape(N, K, out_size, out_size)
    # NOTE: the PyTorch module declares a bias Parameter but never adds it in
    # forward(); we match that exactly (no bias add).
    return Y


if __name__ == "__main__":
    N, Cin, H, W = 2, 4, 16, 16
    Cout, ksize = 8, 3

    key = jax.random.PRNGKey(0)
    k1, k2, k3 = jax.random.split(key, 3)

    x = jax.random.normal(k1, (N, Cin, H, W), dtype=jnp.float32)

    # Deterministic param init mirroring kaiming_uniform_(a=sqrt(5)):
    # bound = 1 / sqrt(fan_in)
    fan_in = Cin * ksize * ksize
    wbound = 1.0 / math.sqrt(fan_in)
    filt = jax.random.uniform(k2, (Cout, Cin, ksize, ksize), jnp.float32,
                              minval=-wbound, maxval=wbound)
    # bias parameter exists in the module (uniform(-5, 5)) but is unused in forward()
    bias = jax.random.uniform(k3, (Cout,), jnp.float32, minval=-5.0, maxval=5.0)
    del bias

    y = jax.jit(winograd_conv2d)(x, filt)
    y = jax.block_until_ready(y)

    # Sanity check: the Winograd forward computes a stride-1 VALID cross-correlation.
    # (bf16 operands with f32 accumulation -> relative tolerance ~1e-2 level.)
    y_ref = jax.lax.conv_general_dilated(
        x, filt, window_strides=(1, 1), padding='VALID',
        dimension_numbers=('NCHW', 'OIHW', 'NCHW'))
    assert y.shape == (N, Cout, H - ksize + 1, W - ksize + 1)
    rel_err = float(jnp.max(jnp.abs(y - y_ref)) / jnp.max(jnp.abs(y_ref)))
    assert rel_err < 3e-2, f"mismatch vs direct convolution: rel_err={rel_err}"

    print("KERNEL_OK")
</pallas_src>

<mosaic_0001>
module attributes {stable_mosaic.version = 11 : i64} {
  func.func @winograd_fused_kernel(%arg0: i32, %arg1: i32, %arg2: memref<16x16x16xbf16, #tpu.memory_space<vmem>>, %arg3: memref<16x16x128xbf16, #tpu.memory_space<vmem>>, %arg4: memref<4x16x128xf32, #tpu.memory_space<vmem>>) attributes {dimension_semantics = [#tpu.dimension_semantics<parallel>, #tpu.dimension_semantics<parallel>], iteration_bounds = array<i64: 1, 1>, scalar_prefetch = 0 : i64, scratch_operands = 0 : i64, tpu.core_type = #tpu.core_type<tc>, window_params = [{transform_indices = @transform_0, window_bounds = array<i64: 16, 16, 16>}, {transform_indices = @transform_1, window_bounds = array<i64: 16, 16, 128>}, {transform_indices = @transform_2, window_bounds = array<i64: 4, 16, 128>}]} {
    %c0 = arith.constant 0 : index
    %c0_0 = arith.constant 0 : index
    %c0_1 = arith.constant 0 : index
    %0 = vector.load %arg3[%c0, %c0_0, %c0_1] : memref<16x16x128xbf16, #tpu.memory_space<vmem>>, vector<1x16x128xbf16>
    %1 = vector.shape_cast %0 : vector<1x16x128xbf16> to vector<16x128xbf16>
    %2 = arith.extf %1 : vector<16x128xbf16> to vector<16x128xf32>
    %c8 = arith.constant 8 : index
    %c0_2 = arith.constant 0 : index
    %c0_3 = arith.constant 0 : index
    %3 = vector.load %arg3[%c8, %c0_2, %c0_3] : memref<16x16x128xbf16, #tpu.memory_space<vmem>>, vector<1x16x128xbf16>
    %4 = vector.shape_cast %3 : vector<1x16x128xbf16> to vector<16x128xbf16>
    %5 = arith.extf %4 : vector<16x128xbf16> to vector<16x128xf32>
    %cst = arith.constant 0.000000e+00 : f32
    %6 = vector.broadcast %cst : f32 to vector<16x128xf32>
    %7 = arith.subf %6, %5 : vector<16x128xf32>
    %8 = arith.addf %2, %7 : vector<16x128xf32>
    %c1 = arith.constant 1 : index
    %c0_4 = arith.constant 0 : index
    %c0_5 = arith.constant 0 : index
    %9 = vector.load %arg3[%c1, %c0_4, %c0_5] : memref<16x16x128xbf16, #tpu.memory_space<vmem>>, vector<1x16x128xbf16>
    %10 = vector.shape_cast %9 : vector<1x16x128xbf16> to vector<16x128xbf16>
    %11 = arith.extf %10 : vector<16x128xbf16> to vector<16x128xf32>
    %c9 = arith.constant 9 : index
    %c0_6 = arith.constant 0 : index
    %c0_7 = arith.constant 0 : index
    %12 = vector.load %arg3[%c9, %c0_6, %c0_7] : memref<16x16x128xbf16, #tpu.memory_space<vmem>>, vector<1x16x128xbf16>
    %13 = vector.shape_cast %12 : vector<1x16x128xbf16> to vector<16x128xbf16>
    %14 = arith.extf %13 : vector<16x128xbf16> to vector<16x128xf32>
    %cst_8 = arith.constant 0.000000e+00 : f32
    %15 = vector.broadcast %cst_8 : f32 to vector<16x128xf32>
    %16 = arith.subf %15, %14 : vector<16x128xf32>
    %17 = arith.addf %11, %16 : vector<16x128xf32>
    %c2 = arith.constant 2 : index
    %c0_9 = arith.constant 0 : index
    %c0_10 = arith.constant 0 : index
    %18 = vector.load %arg3[%c2, %c0_9, %c0_10] : memref<16x16x128xbf16, #tpu.memory_space<vmem>>, vector<1x16x128xbf16>
    %19 = vector.shape_cast %18 : vector<1x16x128xbf16> to vector<16x128xbf16>
    %20 = arith.extf %19 : vector<16x128xbf16> to vector<16x128xf32>
    %c10 = arith.constant 10 : index
    %c0_11 = arith.constant 0 : index
    %c0_12 = arith.constant 0 : index
    %21 = vector.load %arg3[%c10, %c0_11, %c0_12] : memref<16x16x128xbf16, #tpu.memory_space<vmem>>, vector<1x16x128xbf16>
    %22 = vector.shape_cast %21 : vector<1x16x128xbf16> to vector<16x128xbf16>
    %23 = arith.extf %22 : vector<16x128xbf16> to vector<16x128xf32>
    %cst_13 = arith.constant 0.000000e+00 : f32
    %24 = vector.broadcast %cst_13 : f32 to vector<16x128xf32>
    %25 = arith.subf %24, %23 : vector<16x128xf32>
    %26 = arith.addf %20, %25 : vector<16x128xf32>
    %c3 = arith.constant 3 : index
    %c0_14 = arith.constant 0 : index
    %c0_15 = arith.constant 0 : index
    %27 = vector.load %arg3[%c3, %c0_14, %c0_15] : memref<16x16x128xbf16, #tpu.memory_space<vmem>>, vector<1x16x128xbf16>
    %28 = vector.shape_cast %27 : vector<1x16x128xbf16> to vector<16x128xbf16>
    %29 = arith.extf %28 : vector<16x128xbf16> to vector<16x128xf32>
    %c11 = arith.constant 11 : index
    %c0_16 = arith.constant 0 : index
    %c0_17 = arith.constant 0 : index
    %30 = vector.load %arg3[%c11, %c0_16, %c0_17] : memref<16x16x128xbf16, #tpu.memory_space<vmem>>, vector<1x16x128xbf16>
    %31 = vector.shape_cast %30 : vector<1x16x128xbf16> to vector<16x128xbf16>
    %32 = arith.extf %31 : vector<16x128xbf16> to vector<16x128xf32>
    %cst_18 = arith.constant 0.000000e+00 : f32
    %33 = vector.broadcast %cst_18 : f32 to vector<16x128xf32>
    %34 = arith.subf %33, %32 : vector<16x128xf32>
    %35 = arith.addf %29, %34 : vector<16x128xf32>
    %cst_19 = arith.constant 0.000000e+00 : f32
    %36 = vector.broadcast %cst_19 : f32 to vector<16x128xf32>
    %37 = arith.subf %36, %26 : vector<16x128xf32>
    %38 = arith.addf %8, %37 : vector<16x128xf32>
    %c0_20 = arith.constant 0 : index
    %c0_21 = arith.constant 0 : index
    %c0_22 = arith.constant 0 : index
    %39 = vector.load %arg2[%c0_20, %c0_21, %c0_22] : memref<16x16x16xbf16, #tpu.memory_space<vmem>>, vector<1x16x16xbf16>
    %40 = vector.shape_cast %39 : vector<1x16x16xbf16> to vector<16x16xbf16>
    %41 = arith.truncf %38 : vector<16x128xf32> to vector<16x128xbf16>
    %cst_23 = arith.constant dense<0.000000e+00> : vector<16x128xf32>
    %42 = tpu.matmul %40, %41, %cst_23 {dimension_numbers = #tpu.dot_dimension_numbers<[1], [0], [0], [1], [0, 0, 1, 1], [], []>} : vector<16x16xbf16>, vector<16x128xbf16>, vector<16x128xf32> -> vector<16x128xf32>
    %43 = arith.addf %17, %26 : vector<16x128xf32>
    %c1_24 = arith.constant 1 : index
    %c0_25 = arith.constant 0 : index
    %c0_26 = arith.constant 0 : index
    %44 = vector.load %arg2[%c1_24, %c0_25, %c0_26] : memref<16x16x16xbf16, #tpu.memory_space<vmem>>, vector<1x16x16xbf16>
    %45 = vector.shape_cast %44 : vector<1x16x16xbf16> to vector<16x16xbf16>
    %46 = arith.truncf %43 : vector<16x128xf32> to vector<16x128xbf16>
    %cst_27 = arith.constant dense<0.000000e+00> : vector<16x128xf32>
    %47 = tpu.matmul %45, %46, %cst_27 {dimension_numbers = #tpu.dot_dimension_numbers<[1], [0], [0], [1], [0, 0, 1, 1], [], []>} : vector<16x16xbf16>, vector<16x128xbf16>, vector<16x128xf32> -> vector<16x128xf32>
    %48 = arith.addf %42, %47 : vector<16x128xf32>
    %cst_28 = arith.constant 0.000000e+00 : f32
    %49 = vector.broadcast %cst_28 : f32 to vector<16x128xf32>
    %50 = arith.subf %49, %17 : vector<16x128xf32>
    %51 = arith.addf %50, %26 : vector<16x128xf32>
    %c2_29 = arith.constant 2 : index
    %c0_30 = arith.constant 0 : index
    %c0_31 = arith.constant 0 : index
    %52 = vector.load %arg2[%c2_29, %c0_30, %c0_31] : memref<16x16x16xbf16, #tpu.memory_space<vmem>>, vector<1x16x16xbf16>
    %53 = vector.shape_cast %52 : vector<1x16x16xbf16> to vector<16x16xbf16>
    %54 = arith.truncf %51 : vector<16x128xf32> to vector<16x128xbf16>
    %cst_32 = arith.constant dense<0.000000e+00> : vector<16x128xf32>
    %55 = tpu.matmul %53, %54, %cst_32 {dimension_numbers = #tpu.dot_dimension_numbers<[1], [0], [0], [1], [0, 0, 1, 1], [], []>} : vector<16x16xbf16>, vector<16x128xbf16>, vector<16x128xf32> -> vector<16x128xf32>
    %56 = arith.addf %48, %55 : vector<16x128xf32>
    %cst_33 = arith.constant 0.000000e+00 : f32
    %57 = vector.broadcast %cst_33 : f32 to vector<16x128xf32>
    %58 = arith.subf %57, %55 : vector<16x128xf32>
    %59 = arith.addf %47, %58 : vector<16x128xf32>
    %cst_34 = arith.constant 0.000000e+00 : f32
    %60 = vector.broadcast %cst_34 : f32 to vector<16x128xf32>
    %61 = arith.subf %60, %35 : vector<16x128xf32>
    %62 = arith.addf %17, %61 : vector<16x128xf32>
    %c3_35 = arith.constant 3 : index
    %c0_36 = arith.constant 0 : index
    %c0_37 = arith.constant 0 : index
    %63 = vector.load %arg2[%c3_35, %c0_36, %c0_37] : memref<16x16x16xbf16, #tpu.memory_space<vmem>>, vector<1x16x16xbf16>
    %64 = vector.shape_cast %63 : vector<1x16x16xbf16> to vector<16x16xbf16>
    %65 = arith.truncf %62 : vector<16x128xf32> to vector<16x128xbf16>
    %cst_38 = arith.constant dense<0.000000e+00> : vector<16x128xf32>
    %66 = tpu.matmul %64, %65, %cst_38 {dimension_numbers = #tpu.dot_dimension_numbers<[1], [0], [0], [1], [0, 0, 1, 1], [], []>} : vector<16x16xbf16>, vector<16x128xbf16>, vector<16x128xf32> -> vector<16x128xf32>
    %cst_39 = arith.constant 0.000000e+00 : f32
    %67 = vector.broadcast %cst_39 : f32 to vector<16x128xf32>
    %68 = arith.subf %67, %66 : vector<16x128xf32>
    %69 = arith.addf %59, %68 : vector<16x128xf32>
    %c4 = arith.constant 4 : index
    %c0_40 = arith.constant 0 : index
    %c0_41 = arith.constant 0 : index
    %70 = vector.load %arg3[%c4, %c0_40, %c0_41] : memref<16x16x128xbf16, #tpu.memory_space<vmem>>, vector<1x16x128xbf16>
    %71 = vector.shape_cast %70 : vector<1x16x128xbf16> to vector<16x128xbf16>
    %72 = arith.extf %71 : vector<16x128xbf16> to vector<16x128xf32>
    %c8_42 = arith.constant 8 : index
    %c0_43 = arith.constant 0 : index
    %c0_44 = arith.constant 0 : index
    %73 = vector.load %arg3[%c8_42, %c0_43, %c0_44] : memref<16x16x128xbf16, #tpu.memory_space<vmem>>, vector<1x16x128xbf16>
    %74 = vector.shape_cast %73 : vector<1x16x128xbf16> to vector<16x128xbf16>
    %75 = arith.extf %74 : vector<16x128xbf16> to vector<16x128xf32>
    %76 = arith.addf %72, %75 : vector<16x128xf32>
    %c5 = arith.constant 5 : index
    %c0_45 = arith.constant 0 : index
    %c0_46 = arith.constant 0 : index
    %77 = vector.load %arg3[%c5, %c0_45, %c0_46] : memref<16x16x128xbf16, #tpu.memory_space<vmem>>, vector<1x16x128xbf16>
    %78 = vector.shape_cast %77 : vector<1x16x128xbf16> to vector<16x128xbf16>
    %79 = arith.extf %78 : vector<16x128xbf16> to vector<16x128xf32>
    %c9_47 = arith.constant 9 : index
    %c0_48 = arith.constant 0 : index
    %c0_49 = arith.constant 0 : index
    %80 = vector.load %arg3[%c9_47, %c0_48, %c0_49] : memref<16x16x128xbf16, #tpu.memory_space<vmem>>, vector<1x16x128xbf16>
    %81 = vector.shape_cast %80 : vector<1x16x128xbf16> to vector<16x128xbf16>
    %82 = arith.extf %81 : vector<16x128xbf16> to vector<16x128xf32>
    %83 = arith.addf %79, %82 : vector<16x128xf32>
    %c6 = arith.constant 6 : index
    %c0_50 = arith.constant 0 : index
    %c0_51 = arith.constant 0 : index
    %84 = vector.load %arg3[%c6, %c0_50, %c0_51] : memref<16x16x128xbf16, #tpu.memory_space<vmem>>, vector<1x16x128xbf16>
    %85 = vector.shape_cast %84 : vector<1x16x128xbf16> to vector<16x128xbf16>
    %86 = arith.extf %85 : vector<16x128xbf16> to vector<16x128xf32>
    %c10_52 = arith.constant 10 : index
    %c0_53 = arith.constant 0 : index
    %c0_54 = arith.constant 0 : index
    %87 = vector.load %arg3[%c10_52, %c0_53, %c0_54] : memref<16x16x128xbf16, #tpu.memory_space<vmem>>, vector<1x16x128xbf16>
    %88 = vector.shape_cast %87 : vector<1x16x128xbf16> to vector<16x128xbf16>
    %89 = arith.extf %88 : vector<16x128xbf16> to vector<16x128xf32>
    %90 = arith.addf %86, %89 : vector<16x128xf32>
    %c7 = arith.constant 7 : index
    %c0_55 = arith.constant 0 : index
    %c0_56 = arith.constant 0 : index
    %91 = vector.load %arg3[%c7, %c0_55, %c0_56] : memref<16x16x128xbf16, #tpu.memory_space<vmem>>, vector<1x16x128xbf16>
    %92 = vector.shape_cast %91 : vector<1x16x128xbf16> to vector<16x128xbf16>
    %93 = arith.extf %92 : vector<16x128xbf16> to vector<16x128xf32>
    %c11_57 = arith.constant 11 : index
    %c0_58 = arith.constant 0 : index
    %c0_59 = arith.constant 0 : index
    %94 = vector.load %arg3[%c11_57, %c0_58, %c0_59] : memref<16x16x128xbf16, #tpu.memory_space<vmem>>, vector<1x16x128xbf16>
    %95 = vector.shape_cast %94 : vector<1x16x128xbf16> to vector<16x128xbf16>
    %96 = arith.extf %95 : vector<16x128xbf16> to vector<16x128xf32>
    %97 = arith.addf %93, %96 : vector<16x128xf32>
    %cst_60 = arith.constant 0.000000e+00 : f32
    %98 = vector.broadcast %cst_60 : f32 to vector<16x128xf32>
    %99 = arith.subf %98, %90 : vector<16x128xf32>
    %100 = arith.addf %76, %99 : vector<16x128xf32>
    %c4_61 = arith.constant 4 : index
    %c0_62 = arith.constant 0 : index
    %c0_63 = arith.constant 0 : index
    %101 = vector.load %arg2[%c4_61, %c0_62, %c0_63] : memref<16x16x16xbf16, #tpu.memory_space<vmem>>, vector<1x16x16xbf16>
    %102 = vector.shape_cast %101 : vector<1x16x16xbf16> to vector<16x16xbf16>
    %103 = arith.truncf %100 : vector<16x128xf32> to vector<16x128xbf16>
    %cst_64 = arith.constant dense<0.000000e+00> : vector<16x128xf32>
    %104 = tpu.matmul %102, %103, %cst_64 {dimension_numbers = #tpu.dot_dimension_numbers<[1], [0], [0], [1], [0, 0, 1, 1], [], []>} : vector<16x16xbf16>, vector<16x128xbf16>, vector<16x128xf32> -> vector<16x128xf32>
    %105 = arith.addf %83, %90 : vector<16x128xf32>
    %c5_65 = arith.constant 5 : index
    %c0_66 = arith.constant 0 : index
    %c0_67 = arith.constant 0 : index
    %106 = vector.load %arg2[%c5_65, %c0_66, %c0_67] : memref<16x16x16xbf16, #tpu.memory_space<vmem>>, vector<1x16x16xbf16>
    %107 = vector.shape_cast %106 : vector<1x16x16xbf16> to vector<16x16xbf16>
    %108 = arith.truncf %105 : vector<16x128xf32> to vector<16x128xbf16>
    %cst_68 = arith.constant dense<0.000000e+00> : vector<16x128xf32>
    %109 = tpu.matmul %107, %108, %cst_68 {dimension_numbers = #tpu.dot_dimension_numbers<[1], [0], [0], [1], [0, 0, 1, 1], [], []>} : vector<16x16xbf16>, vector<16x128xbf16>, vector<16x128xf32> -> vector<16x128xf32>
    %110 = arith.addf %104, %109 : vector<16x128xf32>
    %cst_69 = arith.constant 0.000000e+00 : f32
    %111 = vector.broadcast %cst_69 : f32 to vector<16x128xf32>
    %112 = arith.subf %111, %83 : vector<16x128xf32>
    %113 = arith.addf %112, %90 : vector<16x128xf32>
    %c6_70 = arith.constant 6 : index
    %c0_71 = arith.constant 0 : index
    %c0_72 = arith.constant 0 : index
    %114 = vector.load %arg2[%c6_70, %c0_71, %c0_72] : memref<16x16x16xbf16, #tpu.memory_space<vmem>>, vector<1x16x16xbf16>
    %115 = vector.shape_cast %114 : vector<1x16x16xbf16> to vector<16x16xbf16>
    %116 = arith.truncf %113 : vector<16x128xf32> to vector<16x128xbf16>
    %cst_73 = arith.constant dense<0.000000e+00> : vector<16x128xf32>
    %117 = tpu.matmul %115, %116, %cst_73 {dimension_numbers = #tpu.dot_dimension_numbers<[1], [0], [0], [1], [0, 0, 1, 1], [], []>} : vector<16x16xbf16>, vector<16x128xbf16>, vector<16x128xf32> -> vector<16x128xf32>
    %118 = arith.addf %110, %117 : vector<16x128xf32>
    %cst_74 = arith.constant 0.000000e+00 : f32
    %119 = vector.broadcast %cst_74 : f32 to vector<16x128xf32>
    %120 = arith.subf %119, %117 : vector<16x128xf32>
    %121 = arith.addf %109, %120 : vector<16x128xf32>
    %cst_75 = arith.constant 0.000000e+00 : f32
    %122 = vector.broadcast %cst_75 : f32 to vector<16x128xf32>
    %123 = arith.subf %122, %97 : vector<16x128xf32>
    %124 = arith.addf %83, %123 : vector<16x128xf32>
    %c7_76 = arith.constant 7 : index
    %c0_77 = arith.constant 0 : index
    %c0_78 = arith.constant 0 : index
    %125 = vector.load %arg2[%c7_76, %c0_77, %c0_78] : memref<16x16x16xbf16, #tpu.memory_space<vmem>>, vector<1x16x16xbf16>
    %126 = vector.shape_cast %125 : vector<1x16x16xbf16> to vector<16x16xbf16>
    %127 = arith.truncf %124 : vector<16x128xf32> to vector<16x128xbf16>
    %cst_79 = arith.constant dense<0.000000e+00> : vector<16x128xf32>
    %128 = tpu.matmul %126, %127, %cst_79 {dimension_numbers = #tpu.dot_dimension_numbers<[1], [0], [0], [1], [0, 0, 1, 1], [], []>} : vector<16x16xbf16>, vector<16x128xbf16>, vector<16x128xf32> -> vector<16x128xf32>
    %cst_80 = arith.constant 0.000000e+00 : f32
    %129 = vector.broadcast %cst_80 : f32 to vector<16x128xf32>
    %130 = arith.subf %129, %128 : vector<16x128xf32>
    %131 = arith.addf %121, %130 : vector<16x128xf32>
    %132 = arith.addf %56, %118 : vector<16x128xf32>
    %133 = arith.addf %69, %131 : vector<16x128xf32>
    %c4_81 = arith.constant 4 : index
    %c0_82 = arith.constant 0 : index
    %c0_83 = arith.constant 0 : index
    %134 = vector.load %arg3[%c4_81, %c0_82, %c0_83] : memref<16x16x128xbf16, #tpu.memory_space<vmem>>, vector<1x16x128xbf16>
    %135 = vector.shape_cast %134 : vector<1x16x128xbf16> to vector<16x128xbf16>
    %136 = arith.extf %135 : vector<16x128xbf16> to vector<16x128xf32>
    %cst_84 = arith.constant 0.000000e+00 : f32
    %137 = vector.broadcast %cst_84 : f32 to vector<16x128xf32>
    %138 = arith.subf %137, %136 : vector<16x128xf32>
    %c8_85 = arith.constant 8 : index
    %c0_86 = arith.constant 0 : index
    %c0_87 = arith.constant 0 : index
    %139 = vector.load %arg3[%c8_85, %c0_86, %c0_87] : memref<16x16x128xbf16, #tpu.memory_space<vmem>>, vector<1x16x128xbf16>
    %140 = vector.shape_cast %139 : vector<1x16x128xbf16> to vector<16x128xbf16>
    %141 = arith.extf %140 : vector<16x128xbf16> to vector<16x128xf32>
    %142 = arith.addf %138, %141 : vector<16x128xf32>
    %c5_88 = arith.constant 5 : index
    %c0_89 = arith.constant 0 : index
    %c0_90 = arith.constant 0 : index
    %143 = vector.load %arg3[%c5_88, %c0_89, %c0_90] : memref<16x16x128xbf16, #tpu.memory_space<vmem>>, vector<1x16x128xbf16>
    %144 = vector.shape_cast %143 : vector<1x16x128xbf16> to vector<16x128xbf16>
    %145 = arith.extf %144 : vector<16x128xbf16> to vector<16x128xf32>
    %cst_91 = arith.constant 0.000000e+00 : f32
    %146 = vector.broadcast %cst_91 : f32 to vector<16x128xf32>
    %147 = arith.subf %146, %145 : vector<16x128xf32>
    %c9_92 = arith.constant 9 : index
    %c0_93 = arith.constant 0 : index
    %c0_94 = arith.constant 0 : index
    %148 = vector.load %arg3[%c9_92, %c0_93, %c0_94] : memref<16x16x128xbf16, #tpu.memory_space<vmem>>, vector<1x16x128xbf16>
    %149 = vector.shape_cast %148 : vector<1x16x128xbf16> to vector<16x128xbf16>
    %150 = arith.extf %149 : vector<16x128xbf16> to vector<16x128xf32>
    %151 = arith.addf %147, %150 : vector<16x128xf32>
    %c6_95 = arith.constant 6 : index
    %c0_96 = arith.constant 0 : index
    %c0_97 = arith.constant 0 : index
    %152 = vector.load %arg3[%c6_95, %c0_96, %c0_97] : memref<16x16x128xbf16, #tpu.memory_space<vmem>>, vector<1x16x128xbf16>
    %153 = vector.shape_cast %152 : vector<1x16x128xbf16> to vector<16x128xbf16>
    %154 = arith.extf %153 : vector<16x128xbf16> to vector<16x128xf32>
    %cst_98 = arith.constant 0.000000e+00 : f32
    %155 = vector.broadcast %cst_98 : f32 to vector<16x128xf32>
    %156 = arith.subf %155, %154 : vector<16x128xf32>
    %c10_99 = arith.constant 10 : index
    %c0_100 = arith.constant 0 : index
    %c0_101 = arith.constant 0 : index
    %157 = vector.load %arg3[%c10_99, %c0_100, %c0_101] : memref<16x16x128xbf16, #tpu.memory_space<vmem>>, vector<1x16x128xbf16>
    %158 = vector.shape_cast %157 : vector<1x16x128xbf16> to vector<16x128xbf16>
    %159 = arith.extf %158 : vector<16x128xbf16> to vector<16x128xf32>
    %160 = arith.addf %156, %159 : vector<16x128xf32>
    %c7_102 = arith.constant 7 : index
    %c0_103 = arith.constant 0 : index
    %c0_104 = arith.constant 0 : index
    %161 = vector.load %arg3[%c7_102, %c0_103, %c0_104] : memref<16x16x128xbf16, #tpu.memory_space<vmem>>, vector<1x16x128xbf16>
    %162 = vector.shape_cast %161 : vector<1x16x128xbf16> to vector<16x128xbf16>
    %163 = arith.extf %162 : vector<16x128xbf16> to vector<16x128xf32>
    %cst_105 = arith.constant 0.000000e+00 : f32
    %164 = vector.broadcast %cst_105 : f32 to vector<16x128xf32>
    %165 = arith.subf %164, %163 : vector<16x128xf32>
    %c11_106 = arith.constant 11 : index
    %c0_107 = arith.constant 0 : index
    %c0_108 = arith.constant 0 : index
    %166 = vector.load %arg3[%c11_106, %c0_107, %c0_108] : memref<16x16x128xbf16, #tpu.memory_space<vmem>>, vector<1x16x128xbf16>
    %167 = vector.shape_cast %166 : vector<1x16x128xbf16> to vector<16x128xbf16>
    %168 = arith.extf %167 : vector<16x128xbf16> to vector<16x128xf32>
    %169 = arith.addf %165, %168 : vector<16x128xf32>
    %cst_109 = arith.constant 0.000000e+00 : f32
    %170 = vector.broadcast %cst_109 : f32 to vector<16x128xf32>
    %171 = arith.subf %170, %160 : vector<16x128xf32>
    %172 = arith.addf %142, %171 : vector<16x128xf32>
    %c8_110 = arith.constant 8 : index
    %c0_111 = arith.constant 0 : index
    %c0_112 = arith.constant 0 : index
    %173 = vector.load %arg2[%c8_110, %c0_111, %c0_112] : memref<16x16x16xbf16, #tpu.memory_space<vmem>>, vector<1x16x16xbf16>
    %174 = vector.shape_cast %173 : vector<1x16x16xbf16> to vector<16x16xbf16>
    %175 = arith.truncf %172 : vector<16x128xf32> to vector<16x128xbf16>
    %cst_113 = arith.constant dense<0.000000e+00> : vector<16x128xf32>
    %176 = tpu.matmul %174, %175, %cst_113 {dimension_numbers = #tpu.dot_dimension_numbers<[1], [0], [0], [1], [0, 0, 1, 1], [], []>} : vector<16x16xbf16>, vector<16x128xbf16>, vector<16x128xf32> -> vector<16x128xf32>
    %177 = arith.addf %151, %160 : vector<16x128xf32>
    %c9_114 = arith.constant 9 : index
    %c0_115 = arith.constant 0 : index
    %c0_116 = arith.constant 0 : index
    %178 = vector.load %arg2[%c9_114, %c0_115, %c0_116] : memref<16x16x16xbf16, #tpu.memory_space<vmem>>, vector<1x16x16xbf16>
    %179 = vector.shape_cast %178 : vector<1x16x16xbf16> to vector<16x16xbf16>
    %180 = arith.truncf %177 : vector<16x128xf32> to vector<16x128xbf16>
    %cst_117 = arith.constant dense<0.000000e+00> : vector<16x128xf32>
    %181 = tpu.matmul %179, %180, %cst_117 {dimension_numbers = #tpu.dot_dimension_numbers<[1], [0], [0], [1], [0, 0, 1, 1], [], []>} : vector<16x16xbf16>, vector<16x128xbf16>, vector<16x128xf32> -> vector<16x128xf32>
    %182 = arith.addf %176, %181 : vector<16x128xf32>
    %cst_118 = arith.constant 0.000000e+00 : f32
    %183 = vector.broadcast %cst_118 : f32 to vector<16x128xf32>
    %184 = arith.subf %183, %151 : vector<16x128xf32>
    %185 = arith.addf %184, %160 : vector<16x128xf32>
    %c10_119 = arith.constant 10 : index
    %c0_120 = arith.constant 0 : index
    %c0_121 = arith.constant 0 : index
    %186 = vector.load %arg2[%c10_119, %c0_120, %c0_121] : memref<16x16x16xbf16, #tpu.memory_space<vmem>>, vector<1x16x16xbf16>
    %187 = vector.shape_cast %186 : vector<1x16x16xbf16> to vector<16x16xbf16>
    %188 = arith.truncf %185 : vector<16x128xf32> to vector<16x128xbf16>
    %cst_122 = arith.constant dense<0.000000e+00> : vector<16x128xf32>
    %189 = tpu.matmul %187, %188, %cst_122 {dimension_numbers = #tpu.dot_dimension_numbers<[1], [0], [0], [1], [0, 0, 1, 1], [], []>} : vector<16x16xbf16>, vector<16x128xbf16>, vector<16x128xf32> -> vector<16x128xf32>
    %190 = arith.addf %182, %189 : vector<16x128xf32>
    %cst_123 = arith.constant 0.000000e+00 : f32
    %191 = vector.broadcast %cst_123 : f32 to vector<16x128xf32>
    %192 = arith.subf %191, %189 : vector<16x128xf32>
    %193 = arith.addf %181, %192 : vector<16x128xf32>
    %cst_124 = arith.constant 0.000000e+00 : f32
    %194 = vector.broadcast %cst_124 : f32 to vector<16x128xf32>
    %195 = arith.subf %194, %169 : vector<16x128xf32>
    %196 = arith.addf %151, %195 : vector<16x128xf32>
    %c11_125 = arith.constant 11 : index
    %c0_126 = arith.constant 0 : index
    %c0_127 = arith.constant 0 : index
    %197 = vector.load %arg2[%c11_125, %c0_126, %c0_127] : memref<16x16x16xbf16, #tpu.memory_space<vmem>>, vector<1x16x16xbf16>
    %198 = vector.shape_cast %197 : vector<1x16x16xbf16> to vector<16x16xbf16>
    %199 = arith.truncf %196 : vector<16x128xf32> to vector<16x128xbf16>
    %cst_128 = arith.constant dense<0.000000e+00> : vector<16x128xf32>
    %200 = tpu.matmul %198, %199, %cst_128 {dimension_numbers = #tpu.dot_dimension_numbers<[1], [0], [0], [1], [0, 0, 1, 1], [], []>} : vector<16x16xbf16>, vector<16x128xbf16>, vector<16x128xf32> -> vector<16x128xf32>
    %cst_129 = arith.constant 0.000000e+00 : f32
    %201 = vector.broadcast %cst_129 : f32 to vector<16x128xf32>
    %202 = arith.subf %201, %200 : vector<16x128xf32>
    %203 = arith.addf %193, %202 : vector<16x128xf32>
    %204 = arith.addf %132, %190 : vector<16x128xf32>
    %205 = arith.addf %133, %203 : vector<16x128xf32>
    %cst_130 = arith.constant 0.000000e+00 : f32
    %206 = vector.broadcast %cst_130 : f32 to vector<16x128xf32>
    %207 = arith.subf %206, %190 : vector<16x128xf32>
    %208 = arith.addf %118, %207 : vector<16x128xf32>
    %cst_131 = arith.constant 0.000000e+00 : f32
    %209 = vector.broadcast %cst_131 : f32 to vector<16x128xf32>
    %210 = arith.subf %209, %203 : vector<16x128xf32>
    %211 = arith.addf %131, %210 : vector<16x128xf32>
    %c4_132 = arith.constant 4 : index
    %c0_133 = arith.constant 0 : index
    %c0_134 = arith.constant 0 : index
    %212 = vector.load %arg3[%c4_132, %c0_133, %c0_134] : memref<16x16x128xbf16, #tpu.memory_space<vmem>>, vector<1x16x128xbf16>
    %213 = vector.shape_cast %212 : vector<1x16x128xbf16> to vector<16x128xbf16>
    %214 = arith.extf %213 : vector<16x128xbf16> to vector<16x128xf32>
    %c12 = arith.constant 12 : index
    %c0_135 = arith.constant 0 : index
    %c0_136 = arith.constant 0 : index
    %215 = vector.load %arg3[%c12, %c0_135, %c0_136] : memref<16x16x128xbf16, #tpu.memory_space<vmem>>, vector<1x16x128xbf16>
    %216 = vector.shape_cast %215 : vector<1x16x128xbf16> to vector<16x128xbf16>
    %217 = arith.extf %216 : vector<16x128xbf16> to vector<16x128xf32>
    %cst_137 = arith.constant 0.000000e+00 : f32
    %218 = vector.broadcast %cst_137 : f32 to vector<16x128xf32>
    %219 = arith.subf %218, %217 : vector<16x128xf32>
    %220 = arith.addf %214, %219 : vector<16x128xf32>
    %c5_138 = arith.constant 5 : index
    %c0_139 = arith.constant 0 : index
    %c0_140 = arith.constant 0 : index
    %221 = vector.load %arg3[%c5_138, %c0_139, %c0_140] : memref<16x16x128xbf16, #tpu.memory_space<vmem>>, vector<1x16x128xbf16>
    %222 = vector.shape_cast %221 : vector<1x16x128xbf16> to vector<16x128xbf16>
    %223 = arith.extf %222 : vector<16x128xbf16> to vector<16x128xf32>
    %c13 = arith.constant 13 : index
    %c0_141 = arith.constant 0 : index
    %c0_142 = arith.constant 0 : index
    %224 = vector.load %arg3[%c13, %c0_141, %c0_142] : memref<16x16x128xbf16, #tpu.memory_space<vmem>>, vector<1x16x128xbf16>
    %225 = vector.shape_cast %224 : vector<1x16x128xbf16> to vector<16x128xbf16>
    %226 = arith.extf %225 : vector<16x128xbf16> to vector<16x128xf32>
    %cst_143 = arith.constant 0.000000e+00 : f32
    %227 = vector.broadcast %cst_143 : f32 to vector<16x128xf32>
    %228 = arith.subf %227, %226 : vector<16x128xf32>
    %229 = arith.addf %223, %228 : vector<16x128xf32>
    %c6_144 = arith.constant 6 : index
    %c0_145 = arith.constant 0 : index
    %c0_146 = arith.constant 0 : index
    %230 = vector.load %arg3[%c6_144, %c0_145, %c0_146] : memref<16x16x128xbf16, #tpu.memory_space<vmem>>, vector<1x16x128xbf16>
    %231 = vector.shape_cast %230 : vector<1x16x128xbf16> to vector<16x128xbf16>
    %232 = arith.extf %231 : vector<16x128xbf16> to vector<16x128xf32>
    %c14 = arith.constant 14 : index
    %c0_147 = arith.constant 0 : index
    %c0_148 = arith.constant 0 : index
    %233 = vector.load %arg3[%c14, %c0_147, %c0_148] : memref<16x16x128xbf16, #tpu.memory_space<vmem>>, vector<1x16x128xbf16>
    %234 = vector.shape_cast %233 : vector<1x16x128xbf16> to vector<16x128xbf16>
    %235 = arith.extf %234 : vector<16x128xbf16> to vector<16x128xf32>
    %cst_149 = arith.constant 0.000000e+00 : f32
    %236 = vector.broadcast %cst_149 : f32 to vector<16x128xf32>
    %237 = arith.subf %236, %235 : vector<16x128xf32>
    %238 = arith.addf %232, %237 : vector<16x128xf32>
    %c7_150 = arith.constant 7 : index
    %c0_151 = arith.constant 0 : index
    %c0_152 = arith.constant 0 : index
    %239 = vector.load %arg3[%c7_150, %c0_151, %c0_152] : memref<16x16x128xbf16, #tpu.memory_space<vmem>>, vector<1x16x128xbf16>
    %240 = vector.shape_cast %239 : vector<1x16x128xbf16> to vector<16x128xbf16>
    %241 = arith.extf %240 : vector<16x128xbf16> to vector<16x128xf32>
    %c15 = arith.constant 15 : index
    %c0_153 = arith.constant 0 : index
    %c0_154 = arith.constant 0 : index
    %242 = vector.load %arg3[%c15, %c0_153, %c0_154] : memref<16x16x128xbf16, #tpu.memory_space<vmem>>, vector<1x16x128xbf16>
    %243 = vector.shape_cast %242 : vector<1x16x128xbf16> to vector<16x128xbf16>
    %244 = arith.extf %243 : vector<16x128xbf16> to vector<16x128xf32>
    %cst_155 = arith.constant 0.000000e+00 : f32
    %245 = vector.broadcast %cst_155 : f32 to vector<16x128xf32>
    %246 = arith.subf %245, %244 : vector<16x128xf32>
    %247 = arith.addf %241, %246 : vector<16x128xf32>
    %cst_156 = arith.constant 0.000000e+00 : f32
    %248 = vector.broadcast %cst_156 : f32 to vector<16x128xf32>
    %249 = arith.subf %248, %238 : vector<16x128xf32>
    %250 = arith.addf %220, %249 : vector<16x128xf32>
    %c12_157 = arith.constant 12 : index
    %c0_158 = arith.constant 0 : index
    %c0_159 = arith.constant 0 : index
    %251 = vector.load %arg2[%c12_157, %c0_158, %c0_159] : memref<16x16x16xbf16, #tpu.memory_space<vmem>>, vector<1x16x16xbf16>
    %252 = vector.shape_cast %251 : vector<1x16x16xbf16> to vector<16x16xbf16>
    %253 = arith.truncf %250 : vector<16x128xf32> to vector<16x128xbf16>
    %cst_160 = arith.constant dense<0.000000e+00> : vector<16x128xf32>
    %254 = tpu.matmul %252, %253, %cst_160 {dimension_numbers = #tpu.dot_dimension_numbers<[1], [0], [0], [1], [0, 0, 1, 1], [], []>} : vector<16x16xbf16>, vector<16x128xbf16>, vector<16x128xf32> -> vector<16x128xf32>
    %255 = arith.addf %229, %238 : vector<16x128xf32>
    %c13_161 = arith.constant 13 : index
    %c0_162 = arith.constant 0 : index
    %c0_163 = arith.constant 0 : index
    %256 = vector.load %arg2[%c13_161, %c0_162, %c0_163] : memref<16x16x16xbf16, #tpu.memory_space<vmem>>, vector<1x16x16xbf16>
    %257 = vector.shape_cast %256 : vector<1x16x16xbf16> to vector<16x16xbf16>
    %258 = arith.truncf %255 : vector<16x128xf32> to vector<16x128xbf16>
    %cst_164 = arith.constant dense<0.000000e+00> : vector<16x128xf32>
    %259 = tpu.matmul %257, %258, %cst_164 {dimension_numbers = #tpu.dot_dimension_numbers<[1], [0], [0], [1], [0, 0, 1, 1], [], []>} : vector<16x16xbf16>, vector<16x128xbf16>, vector<16x128xf32> -> vector<16x128xf32>
    %260 = arith.addf %254, %259 : vector<16x128xf32>
    %cst_165 = arith.constant 0.000000e+00 : f32
    %261 = vector.broadcast %cst_165 : f32 to vector<16x128xf32>
    %262 = arith.subf %261, %229 : vector<16x128xf32>
    %263 = arith.addf %262, %238 : vector<16x128xf32>
    %c14_166 = arith.constant 14 : index
    %c0_167 = arith.constant 0 : index
    %c0_168 = arith.constant 0 : index
    %264 = vector.load %arg2[%c14_166, %c0_167, %c0_168] : memref<16x16x16xbf16, #tpu.memory_space<vmem>>, vector<1x16x16xbf16>
    %265 = vector.shape_cast %264 : vector<1x16x16xbf16> to vector<16x16xbf16>
    %266 = arith.truncf %263 : vector<16x128xf32> to vector<16x128xbf16>
    %cst_169 = arith.constant dense<0.000000e+00> : vector<16x128xf32>
    %267 = tpu.matmul %265, %266, %cst_169 {dimension_numbers = #tpu.dot_dimension_numbers<[1], [0], [0], [1], [0, 0, 1, 1], [], []>} : vector<16x16xbf16>, vector<16x128xbf16>, vector<16x128xf32> -> vector<16x128xf32>
    %268 = arith.addf %260, %267 : vector<16x128xf32>
    %cst_170 = arith.constant 0.000000e+00 : f32
    %269 = vector.broadcast %cst_170 : f32 to vector<16x128xf32>
    %270 = arith.subf %269, %267 : vector<16x128xf32>
    %271 = arith.addf %259, %270 : vector<16x128xf32>
    %cst_171 = arith.constant 0.000000e+00 : f32
    %272 = vector.broadcast %cst_171 : f32 to vector<16x128xf32>
    %273 = arith.subf %272, %247 : vector<16x128xf32>
    %274 = arith.addf %229, %273 : vector<16x128xf32>
    %c15_172 = arith.constant 15 : index
    %c0_173 = arith.constant 0 : index
    %c0_174 = arith.constant 0 : index
    %275 = vector.load %arg2[%c15_172, %c0_173, %c0_174] : memref<16x16x16xbf16, #tpu.memory_space<vmem>>, vector<1x16x16xbf16>
    %276 = vector.shape_cast %275 : vector<1x16x16xbf16> to vector<16x16xbf16>
    %277 = arith.truncf %274 : vector<16x128xf32> to vector<16x128xbf16>
    %cst_175 = arith.constant dense<0.000000e+00> : vector<16x128xf32>
    %278 = tpu.matmul %276, %277, %cst_175 {dimension_numbers = #tpu.dot_dimension_numbers<[1], [0], [0], [1], [0, 0, 1, 1], [], []>} : vector<16x16xbf16>, vector<16x128xbf16>, vector<16x128xf32> -> vector<16x128xf32>
    %cst_176 = arith.constant 0.000000e+00 : f32
    %279 = vector.broadcast %cst_176 : f32 to vector<16x128xf32>
    %280 = arith.subf %279, %278 : vector<16x128xf32>
    %281 = arith.addf %271, %280 : vector<16x128xf32>
    %cst_177 = arith.constant 0.000000e+00 : f32
    %282 = vector.broadcast %cst_177 : f32 to vector<16x128xf32>
    %283 = arith.subf %282, %268 : vector<16x128xf32>
    %284 = arith.addf %208, %283 : vector<16x128xf32>
    %cst_178 = arith.constant 0.000000e+00 : f32
    %285 = vector.broadcast %cst_178 : f32 to vector<16x128xf32>
    %286 = arith.subf %285, %281 : vector<16x128xf32>
    %287 = arith.addf %211, %286 : vector<16x128xf32>
    %c0_179 = arith.constant 0 : index
    %c0_180 = arith.constant 0 : index
    %c0_181 = arith.constant 0 : index
    %288 = vector.load %arg4[%c0_179, %c0_180, %c0_181] : memref<4x16x128xf32, #tpu.memory_space<vmem>>, vector<1x16x128xf32>
    %289 = vector.shape_cast %288 : vector<1x16x128xf32> to vector<16x128xf32>
    %290 = vector.shape_cast %204 : vector<16x128xf32> to vector<1x16x128xf32>
    tpu.vector_store %arg4[%c0_179, %c0_180, %c0_181], %290 {strides = array<i32>} : memref<4x16x128xf32, #tpu.memory_space<vmem>>, vector<1x16x128xf32>,
    %c1_182 = arith.constant 1 : index
    %c0_183 = arith.constant 0 : index
    %c0_184 = arith.constant 0 : index
    %291 = vector.load %arg4[%c1_182, %c0_183, %c0_184] : memref<4x16x128xf32, #tpu.memory_space<vmem>>, vector<1x16x128xf32>
    %292 = vector.shape_cast %291 : vector<1x16x128xf32> to vector<16x128xf32>
    %293 = vector.shape_cast %205 : vector<16x128xf32> to vector<1x16x128xf32>
    tpu.vector_store %arg4[%c1_182, %c0_183, %c0_184], %293 {strides = array<i32>} : memref<4x16x128xf32, #tpu.memory_space<vmem>>, vector<1x16x128xf32>,
    %c2_185 = arith.constant 2 : index
    %c0_186 = arith.constant 0 : index
    %c0_187 = arith.constant 0 : index
    %294 = vector.load %arg4[%c2_185, %c0_186, %c0_187] : memref<4x16x128xf32, #tpu.memory_space<vmem>>, vector<1x16x128xf32>
    %295 = vector.shape_cast %294 : vector<1x16x128xf32> to vector<16x128xf32>
    %296 = vector.shape_cast %284 : vector<16x128xf32> to vector<1x16x128xf32>
    tpu.vector_store %arg4[%c2_185, %c0_186, %c0_187], %296 {strides = array<i32>} : memref<4x16x128xf32, #tpu.memory_space<vmem>>, vector<1x16x128xf32>,
    %c3_188 = arith.constant 3 : index
    %c0_189 = arith.constant 0 : index
    %c0_190 = arith.constant 0 : index
    %297 = vector.load %arg4[%c3_188, %c0_189, %c0_190] : memref<4x16x128xf32, #tpu.memory_space<vmem>>, vector<1x16x128xf32>
    %298 = vector.shape_cast %297 : vector<1x16x128xf32> to vector<16x128xf32>
    %299 = vector.shape_cast %287 : vector<16x128xf32> to vector<1x16x128xf32>
    tpu.vector_store %arg4[%c3_188, %c0_189, %c0_190], %299 {strides = array<i32>} : memref<4x16x128xf32, #tpu.memory_space<vmem>>, vector<1x16x128xf32>,
    return
  }
  func.func @transform_0(%arg0: i32, %arg1: i32) -> (i32, i32, i32) {
    %c0_i32 = arith.constant 0 : i32
    %c0_i32_0 = arith.constant 0 : i32
    %c0_i32_1 = arith.constant 0 : i32
    return %c0_i32, %arg1, %c0_i32_0 : i32, i32, i32
  }
  func.func @transform_1(%arg0: i32, %arg1: i32) -> (i32, i32, i32) {
    %c0_i32 = arith.constant 0 : i32
    %c0_i32_0 = arith.constant 0 : i32
    %c0_i32_1 = arith.constant 0 : i32
    return %c0_i32, %c0_i32_0, %arg0 : i32, i32, i32
  }
  func.func @transform_2(%arg0: i32, %arg1: i32) -> (i32, i32, i32) {
    %c0_i32 = arith.constant 0 : i32
    %c0_i32_0 = arith.constant 0 : i32
    return %c0_i32, %arg1, %arg0 : i32, i32, i32
  }
}

</mosaic_0001>

<bundles_post_ra>
// kernel: winograd_conv2d.1
= control target key start
LH: loop header
LB: loop body
LE: loop exit
PB: predicated region body
PF: predicated region fallthrough
CT: control target
= control target key end

     0   :  { %v1453_v0 = vmov 0.0   ;;  %vm1454_vm0 = vmmov 0   ;;  %vm85_vm1 = vcmask 130048   ;;  %s1739_s1 = inlined_call_operand.vmem [shape: bf16[16,16,128], index: 1, kind: input, shape index: {}]   ;;  %s1740_s0 = inlined_call_operand.vmem [shape: bf16[16,16,16], index: 0, kind: input, shape index: {}]   ;;  %s1741_s2 = inlined_call_operand.vmem [shape: f32[4,16,128], index: 2, kind: output, shape index: {}]  }
   0x1   :  { %1339 = vmatprep.subr.bf16.mxu0 %v1453_v0  ;;  %v1293_v1 = vld [vmem:[%s1739_s1 + $0x8] sm:$0xff]   ;;  %v1295_v3 = vld [vmem:[%s1739_s1 + $0x10] sm:$0xff]   ;;  %1345 = vmatprep.subr.bf16.mxu1 %v1453_v0  ;;  %v1229_v9 = vld [vmem:[%s1739_s1] sm:$0xff]  }
   0x2   :  { %v1294_v2 = vld [vmem:[%s1739_s1 + $0x48] sm:$0xff]   ;;  %v1238_v4 = vunpack.c.l.bf16 %v1293_v1  ;;  %v1239_v5 = vunpack.c.h.bf16 %v1293_v1  ;;  %v1296_v8 = vld [vmem:[%s1739_s1 + $0x50] sm:$0xff]   ;;  %1341 = vmatprep.mubr.msk.bf16.mxu0 %vm1454_vm0, %v1453_v0  ;;  %v1292_v10 = vld [vmem:[%s1739_s1 + $0x40] sm:$0xff]   ;;  %1347 = vmatprep.mubr.msk.bf16.mxu1 %vm1454_vm0, %v1453_v0  ;;  %v1246_v11 = vunpack.c.l.bf16 %v1295_v3  ;;  %v1247_v12 = vunpack.c.h.bf16 %v1295_v3 }
   0x3   :  { %v1481_v6 = vunpack.c.l.bf16 %v1294_v2  ;;  %v1483_v7 = vunpack.c.h.bf16 %v1294_v2  ;;  %v1498_v13 = vunpack.c.l.bf16 %v1296_v8  ;;  %v1500_v14 = vunpack.c.h.bf16 %v1296_v8  ;;  %v1297_v23 = vld [vmem:[%s1739_s1 + $0x18] sm:$0xff]   ;;  %v1300_v37 = vld [vmem:[%s1739_s1 + $0x28] sm:$0xff]   ;;  %v1301_v42 = vld [vmem:[%s1739_s1 + $0x30] sm:$0xff]  }
   0x4   :  { %v1230_v17 = vunpack.c.l.bf16 %v1229_v9  ;;  %v1231_v18 = vunpack.c.h.bf16 %v1229_v9  ;;  %v1506_v21 = vunpack.c.l.bf16 %v1292_v10  ;;  %v1508_v22 = vunpack.c.h.bf16 %v1292_v10  ;;  %v1298_v24 = vld [vmem:[%s1739_s1 + $0x58] sm:$0xff]   ;;  %v1299_v51 = vld [vmem:[%s1739_s1 + $0x20] sm:$0xff]   ;;  %v1437_v54 = vld [vmem:[%s1740_s0 + $0x8] sm:$0xff]  }
   0x5   :  { %v35_v15 = vsub.f32 0.0, %v1481_v6  ;;  %v36_v16 = vsub.f32 0.0, %v1483_v7  ;;  %v49_v19 = vsub.f32 0.0, %v1498_v13  ;;  %v50_v20 = vsub.f32 0.0, %v1500_v14  ;;  %v1438_v2 = vld [vmem:[%s1740_s0] sm:$0xff]  }
   0x6   :  { %v1254_v27 = vunpack.c.l.bf16 %v1297_v23  ;;  %v1255_v28 = vunpack.c.h.bf16 %v1297_v23  ;;  %v21_v31 = vsub.f32 0.0, %v1506_v21  ;;  %v22_v32 = vsub.f32 0.0, %v1508_v22 }
   0x7   :  { %v37_v25 = vadd.f32 %v1238_v4, %v35_v15  ;;  %v38_v26 = vadd.f32 %v1239_v5, %v36_v16  ;;  %v51_v29 = vadd.f32 %v1246_v11, %v49_v19  ;;  %v52_v30 = vadd.f32 %v1247_v12, %v50_v20  ;;  %v1302_v11 = vld [vmem:[%s1739_s1 + $0x38] sm:$0xff]  }
   0x8   :  { %v1518_v35 = vunpack.c.l.bf16 %v1298_v24  ;;  %v1520_v36 = vunpack.c.h.bf16 %v1298_v24  ;;  %v23_v40 = vadd.f32 %v1230_v17, %v21_v31  ;;  %v24_v41 = vadd.f32 %v1231_v18, %v22_v32 }
   0x9   :  { %v179_v33 = vsub.f32 0.0, %v37_v25  ;;  %v180_v34 = vsub.f32 0.0, %v38_v26  ;;  %v74_v38 = vadd.f32 %v51_v29, %v37_v25  ;;  %v75_v39 = vadd.f32 %v52_v30, %v38_v26 }
   0xa   :  { %v67_v43 = vsub.f32 0.0, %v51_v29  ;;  %v68_v44 = vsub.f32 0.0, %v52_v30  ;;  %v63_v48 = vsub.f32 0.0, %v1518_v35  ;;  %v64_v49 = vsub.f32 0.0, %v1520_v36 }
   0xb   :  { %v181_v45 = vadd.f32 %v179_v33, %v51_v29  ;;  %v182_v46 = vadd.f32 %v180_v34, %v52_v30  ;;  %v79_v47 = vpack.c.bf16 %v75_v39, %v74_v38  ;;  %v1530_v50 = vunpack.c.l.bf16 %v1300_v37  ;;  %v1440_v34 = vld [vmem:[%s1740_s0 + $0x18] sm:$0xff]  }
   0xc   :  { %v69_v52 = vadd.f32 %v67_v43, %v23_v40  ;;  %v70_v53 = vadd.f32 %v68_v44, %v24_v41  ;;  %v1538_v56 = vunpack.c.h.bf16 %v1300_v37  ;;  %v65_v57 = vadd.f32 %v1254_v27, %v63_v48  ;;  %v1441_v48 = vld [vmem:[%s1740_s0 + $0x28] sm:$0xff]  }
   0xd   :  { %v186_v55 = vpack.c.bf16 %v182_v46, %v181_v45  ;;  %1340 = vmatpush3.bf16.msra.mxu0 %v79_v47  ;;  %v66_v58 = vadd.f32 %v1255_v28, %v64_v49  ;;  %v1542_v59 = vadd.f32 %v1530_v50, %v1481_v6  ;;  %v1544_v60 = vunpack.c.l.bf16 %v1301_v42 }
   0xe   :  { %v73_v61 = vpack.c.bf16 %v70_v53, %v69_v52  ;;  %1351 = vmatprep.subr.bf16.mxu0 %v1453_v0  ;;  %v316_v62 = vadd.f32 %v1538_v56, %v1483_v7  ;;  %v1549_v63 = vunpack.c.h.bf16 %v1301_v42  ;;  %v1551_v1 = vunpack.c.l.bf16 %v1299_v51 }
   0xf   :  { %v242_v3 = vsub.f32 0.0, %v65_v57  ;;  %v243_v4 = vsub.f32 0.0, %v66_v58  ;;  %v322_v5 = vadd.f32 %v1544_v60, %v1498_v13  ;;  %v1558_v8 = vunpack.c.h.bf16 %v1299_v51  ;;  %v1442_v57 = vld [vmem:[%s1740_s0 + $0x20] sm:$0xff]  }
  0x10   :  { %1346 = vmatpush3.bf16.msra.mxu1 %v73_v61  ;;  %1342 = vmatmul.mubr.msk.bf16.vlgmr.msra.gmra.mrb[0].mxu0 %vm85_vm1, %v1437_v54  ;;  %v323_v9 = vadd.f32 %v1549_v63, %v1500_v14  ;;  %v308_v10 = vadd.f32 %v1551_v1, %v1506_v21  ;;  %v1576_v24 = vunpack.c.l.bf16 %v1302_v11  ;;  %v1583_v28 = vunpack.c.h.bf16 %v1302_v11 }
  0x11   :  { %1352 = vmatpush3.bf16.msra.mxu0 %v186_v55  ;;  %1357 = vmatprep.subr.bf16.mxu1 %v1453_v0  ;;  %v244_v12 = vadd.f32 %v242_v3, %v37_v25  ;;  %v245_v15 = vadd.f32 %v243_v4, %v38_v26  ;;  %v339_v16 = vadd.f32 %v322_v5, %v1542_v59  ;;  %v331_v17 = vsub.f32 0.0, %v322_v5  ;;  %v1439_v25 = vld [vmem:[%s1740_s0 + $0x10] sm:$0xff]   ;;  %v1304_v4 = vld [vmem:[%s1739_s1 + $0x68] sm:$0xff]  }
  0x12   :  { %1353 = vmatprep.mubr.msk.bf16.mxu0 %vm1454_vm0, %v1453_v0  ;;  %1363 = vmatprep.subr.bf16.mxu0 %v1453_v0  ;;  %v340_v18 = vadd.f32 %v323_v9, %v316_v62  ;;  %v309_v19 = vadd.f32 %v1558_v8, %v1508_v22  ;;  %v332_v20 = vsub.f32 0.0, %v323_v9  ;;  %v443_v30 = vsub.f32 0.0, %v1542_v59 }
  0x13   :  { %1348 = vmatmul.mubr.msk.bf16.vlgmr.msra.gmra.mrb[0].mxu1 %vm85_vm1, %v1438_v2  ;;  %v249_v23 = vpack.c.bf16 %v245_v15, %v244_v12  ;;  %v333_v26 = vadd.f32 %v331_v17, %v308_v10  ;;  %v444_v31 = vsub.f32 0.0, %v316_v62  ;;  %v329_v32 = vadd.f32 %v1576_v24, %v1518_v35  ;;  %v1443_v10 = vld [vmem:[%s1740_s0 + $0x30] sm:$0xff]   ;;  %v1303_v17 = vld [vmem:[%s1739_s1 + $0x60] sm:$0xff]  }
  0x14   :  { %1359 = vmatprep.mubr.msk.bf16.mxu1 %vm1454_vm0, %v1453_v0  ;;  %v334_v27 = vadd.f32 %v332_v20, %v309_v19  ;;  %v344_v29 = vpack.c.bf16 %v340_v18, %v339_v16  ;;  %v330_v33 = vadd.f32 %v1583_v28, %v1520_v36  ;;  %v579_v37 = vsub.f32 0.0, %v1544_v60  ;;  %v1444_v20 = vld [vmem:[%s1740_s0 + $0x38] sm:$0xff]  }
  0x15   :  { %1358 = vmatpush3.bf16.msra.mxu1 %v249_v23  ;;  %v506_v39 = vsub.f32 0.0, %v329_v32  ;;  %v580_v41 = vsub.f32 0.0, %v1549_v63  ;;  %v445_v42 = vadd.f32 %v443_v30, %v322_v5  ;;  %v446_v43 = vadd.f32 %v444_v31, %v323_v9 }
  0x16   :  { %1369 = vmatprep.subr.bf16.mxu1 %v1453_v0  ;;  %v338_v38 = vpack.c.bf16 %v334_v27, %v333_v26  ;;  %v507_v40 = vsub.f32 0.0, %v330_v33  ;;  %v575_v44 = vsub.f32 0.0, %v1530_v50  ;;  %v576_v45 = vsub.f32 0.0, %v1538_v56 }
  0x17   :  { %v581_v46 = vadd.f32 %v1498_v13, %v579_v37  ;;  %v571_v47 = vsub.f32 0.0, %v1551_v1  ;;  %v508_v49 = vadd.f32 %v506_v39, %v1542_v59  ;;  %v582_v52 = vadd.f32 %v1500_v14, %v580_v41 }
  0x18   :  { %1354 = vmatmul.mubr.msk.bf16.vlgmr.msra.gmra.mrb[4].mxu0 %vm85_vm1, %v1439_v25  ;;  %v509_v51 = vadd.f32 %v507_v40, %v316_v62  ;;  %v572_v53 = vsub.f32 0.0, %v1558_v8  ;;  %v450_v54 = vpack.c.bf16 %v446_v43, %v445_v42  ;;  %v577_v13 = vadd.f32 %v1481_v6, %v575_v44  ;;  %v1305_v6 = vld [vmem:[%s1739_s1 + $0x70] sm:$0xff]   ;;  %v1445_v43 = vld [vmem:[%s1740_s0 + $0x48] sm:$0xff]  }
  0x19   :  { %1364 = vmatpush3.bf16.msra.mxu0 %v344_v29  ;;  %1365 = vmatprep.mubr.msk.bf16.mxu0 %vm1454_vm0, %v1453_v0  ;;  %v578_v55 = vadd.f32 %v1483_v7, %v576_v45  ;;  %v573_v58 = vadd.f32 %v1506_v21, %v571_v47  ;;  %v583_v59 = vsub.f32 0.0, %v1576_v24  ;;  %v584_v61 = vsub.f32 0.0, %v1583_v28 }
  0x1a   :  { %1375 = vmatprep.subr.bf16.mxu0 %v1453_v0  ;;  %v513_v14 = vpack.c.bf16 %v509_v51, %v508_v49  ;;  %v574_v62 = vadd.f32 %v1508_v22, %v572_v53  ;;  %v587_v2 = vsub.f32 0.0, %v581_v46  ;;  %v588_v3 = vsub.f32 0.0, %v582_v52  ;;  %v1446_v51 = vld [vmem:[%s1740_s0 + $0x40] sm:$0xff]  }
  0x1b   :  { %1360 = vmatmul.mubr.msk.bf16.vlgmr.msra.gmra.mrb[4].mxu1 %vm85_vm1, %v1440_v34  ;;  %v595_v7 = vadd.f32 %v581_v46, %v577_v13  ;;  %v596_v21 = vadd.f32 %v582_v52, %v578_v55  ;;  %v585_v22 = vadd.f32 %v1518_v35, %v583_v59  ;;  %v586_v5 = vadd.f32 %v1520_v36, %v584_v61 }
  0x1c   :  { %1370 = vmatpush3.bf16.msra.mxu1 %v338_v38  ;;  %1371 = vmatprep.mubr.msk.bf16.mxu1 %vm1454_vm0, %v1453_v0  ;;  %v1286_v9 = vunpack.c.l.bf16 %v1305_v6  ;;  %v589_v11 = vadd.f32 %v587_v2, %v573_v58  ;;  %v590_v12 = vadd.f32 %v588_v3, %v574_v62  ;;  %v699_v15 = vsub.f32 0.0, %v577_v13  ;;  %v1306_v38 = vld [vmem:[%s1739_s1 + $0x78] sm:$0xff]  }
  0x1d   :  { %1381 = vmatprep.subr.bf16.mxu1 %v1453_v0  ;;  %v1287_v16 = vunpack.c.h.bf16 %v1305_v6  ;;  %v600_v35 = vpack.c.bf16 %v596_v21, %v595_v7  ;;  %v700_v36 = vsub.f32 0.0, %v578_v55  ;;  %v1282_v18 = vunpack.c.l.bf16 %v1304_v4  ;;  %v1448_v3 = vld [vmem:[%s1740_s0 + $0x58] sm:$0xff]  }
  0x1e   :  { %v1283_v19 = vunpack.c.h.bf16 %v1304_v4  ;;  %v762_v23 = vsub.f32 0.0, %v585_v22  ;;  %v763_v25 = vsub.f32 0.0, %v586_v5  ;;  %v858_v26 = vsub.f32 0.0, %v1286_v9  ;;  %v1449_v4 = vld [vmem:[%s1740_s0 + $0x68] sm:$0xff]  }
  0x1f   :  { %v1278_v27 = vunpack.c.l.bf16 %v1303_v17  ;;  %v594_v29 = vpack.c.bf16 %v590_v12, %v589_v11  ;;  %v859_v30 = vsub.f32 0.0, %v1287_v16  ;;  %v1279_v31 = vunpack.c.h.bf16 %v1303_v17  ;;  %v1451_v12 = vld [vmem:[%s1740_s0 + $0x70] sm:$0xff]  }
  0x20   :  { %1366 = vmatmul.mubr.msk.bf16.vlgmr.msra.gmra.mrb[8].mxu0 %vm85_vm1, %v1441_v48  ;;  %v701_v32 = vadd.f32 %v699_v15, %v581_v46  ;;  %v702_v33 = vadd.f32 %v700_v36, %v582_v52  ;;  %v849_v34 = vsub.f32 0.0, %v1282_v18  ;;  %v850_v37 = vsub.f32 0.0, %v1283_v19  ;;  %v1452_v15 = vld [vmem:[%s1740_s0 + $0x78] sm:$0xff]  }
  0x21   :  { %1376 = vmatpush3.bf16.msra.mxu0 %v450_v54  ;;  %1377 = vmatprep.mubr.msk.bf16.mxu0 %vm1454_vm0, %v1453_v0  ;;  %v764_v39 = vadd.f32 %v762_v23, %v577_v13  ;;  %v765_v40 = vadd.f32 %v763_v25, %v578_v55  ;;  %v860_v41 = vadd.f32 %v1544_v60, %v858_v26  ;;  %v840_v42 = vsub.f32 0.0, %v1278_v27 }
  0x22   :  { %1387 = vmatprep.subr.bf16.mxu0 %v1453_v0  ;;  %v861_v44 = vadd.f32 %v1549_v63, %v859_v30  ;;  %v841_v45 = vsub.f32 0.0, %v1279_v31  ;;  %v1290_v46 = vunpack.c.l.bf16 %v1306_v38  ;;  %v1291_v47 = vunpack.c.h.bf16 %v1306_v38 }
  0x23   :  { %1372 = vmatmul.mubr.msk.bf16.vlgmr.msra.gmra.mrb[8].mxu1 %vm85_vm1, %v1442_v57  ;;  %v706_v48 = vpack.c.bf16 %v702_v33, %v701_v32  ;;  %v851_v49 = vadd.f32 %v1530_v50, %v849_v34  ;;  %v852_v60 = vadd.f32 %v1538_v56, %v850_v37  ;;  %v769_v52 = vpack.c.bf16 %v765_v40, %v764_v39 }
  0x24   :  { %1382 = vmatpush3.bf16.msra.mxu1 %v513_v14  ;;  %1383 = vmatprep.mubr.msk.bf16.mxu1 %vm1454_vm0, %v1453_v0  ;;  %v842_v53 = vadd.f32 %v1551_v1, %v840_v42  ;;  %v871_v54 = vsub.f32 0.0, %v860_v41  ;;  %v843_v63 = vadd.f32 %v1558_v8, %v841_v45  ;;  %v872_v13 = vsub.f32 0.0, %v861_v44  ;;  %v1447_v1 = vld [vmem:[%s1740_s0 + $0x50] sm:$0xff]  }
  0x25   :  { %1393 = vmatprep.subr.bf16.mxu1 %v1453_v0  ;;  %v867_v55 = vsub.f32 0.0, %v1290_v46  ;;  %v868_v57 = vsub.f32 0.0, %v1291_v47  ;;  %v879_v50 = vadd.f32 %v860_v41, %v851_v49  ;;  %v880_v56 = vadd.f32 %v861_v44, %v852_v60 }
  0x26   :  { %v873_v58 = vadd.f32 %v871_v54, %v842_v53  ;;  %v874_v8 = vadd.f32 %v872_v13, %v843_v63  ;;  %v983_v62 = vsub.f32 0.0, %v851_v49  ;;  %v984_v2 = vsub.f32 0.0, %v852_v60 }
  0x27   :  { %v869_v59 = vadd.f32 %v1576_v24, %v867_v55  ;;  %v870_v61 = vadd.f32 %v1583_v28, %v868_v57  ;;  %v884_v14 = vpack.c.bf16 %v880_v56, %v879_v50 }
  0x28   :  { %1378 = vmatmul.mubr.msk.bf16.vlgmr.msra.gmra.mrb[12].mxu0 %vm85_vm1, %v1443_v10  ;;  %v878_v6 = vpack.c.bf16 %v874_v8, %v873_v58  ;;  %v985_v24 = vadd.f32 %v983_v62, %v860_v41  ;;  %v986_v28 = vadd.f32 %v984_v2, %v861_v44  ;;  %v1450_v10 = vld [vmem:[%s1740_s0 + $0x60] sm:$0xff]  }
  0x29   :  { %1388 = vmatpush3.bf16.msra.mxu0 %v600_v35  ;;  %1389 = vmatprep.mubr.msk.bf16.mxu0 %vm1454_vm0, %v1453_v0  ;;  %v1046_v7 = vsub.f32 0.0, %v869_v59  ;;  %v1047_v21 = vsub.f32 0.0, %v870_v61 }
  0x2a   :  { %1399 = vmatprep.subr.bf16.mxu0 %v1453_v0  ;;  %v990_v9 = vpack.c.bf16 %v986_v28, %v985_v24 }
  0x2b   :  { %1384 = vmatmul.mubr.msk.bf16.vlgmr.msra.gmra.mrb[12].mxu1 %vm85_vm1, %v1444_v20  ;;  %v1048_v22 = vadd.f32 %v1046_v7, %v851_v49  ;;  %v1049_v5 = vadd.f32 %v1047_v21, %v852_v60 }
  0x2c   :  { %1394 = vmatpush3.bf16.msra.mxu1 %v594_v29  ;;  %1395 = vmatprep.mubr.msk.bf16.mxu1 %vm1454_vm0, %v1453_v0 }
  0x2d   :  { %1405 = vmatprep.subr.bf16.mxu1 %v1453_v0  ;;  %v1053_v11 = vpack.c.bf16 %v1049_v5, %v1048_v22 }
  0x30   :  { %1390 = vmatmul.mubr.msk.bf16.vlgmr.msra.gmra.mrb[16].mxu0 %vm85_vm1, %v1445_v43 }
  0x31   :  { %1400 = vmatpush3.bf16.msra.mxu0 %v706_v48  ;;  %1401 = vmatprep.mubr.msk.bf16.mxu0 %vm1454_vm0, %v1453_v0 }
  0x32   :  { %1411 = vmatprep.subr.bf16.mxu0 %v1453_v0 }
  0x33   :  { %1396 = vmatmul.mubr.msk.bf16.vlgmr.msra.gmra.mrb[16].mxu1 %vm85_vm1, %v1446_v51 }
  0x34   :  { %1406 = vmatpush3.bf16.msra.mxu1 %v769_v52  ;;  %1407 = vmatprep.mubr.msk.bf16.mxu1 %vm1454_vm0, %v1453_v0 }
  0x35   :  { %1417 = vmatprep.subr.bf16.mxu1 %v1453_v0 }
  0x38   :  { %1402 = vmatmul.mubr.msk.bf16.vlgmr.msra.gmra.mrb[20].mxu0 %vm85_vm1, %v1447_v1 }
  0x39   :  { %1412 = vmatpush3.bf16.msra.mxu0 %v884_v14  ;;  %1413 = vmatprep.mubr.msk.bf16.mxu0 %vm1454_vm0, %v1453_v0 }
  0x3a   :  { %1423 = vmatprep.subr.bf16.mxu0 %v1453_v0 }
  0x3b   :  { %1408 = vmatmul.mubr.msk.bf16.vlgmr.msra.gmra.mrb[20].mxu1 %vm85_vm1, %v1448_v3 }
  0x3c   :  { %1418 = vmatpush3.bf16.msra.mxu1 %v878_v6  ;;  %1419 = vmatprep.mubr.msk.bf16.mxu1 %vm1454_vm0, %v1453_v0 }
  0x3d   :  { %1429 = vmatprep.subr.bf16.mxu1 %v1453_v0 }
  0x40   :  { %1414 = vmatmul.mubr.msk.bf16.vlgmr.msra.gmra.mrb[24].mxu0 %vm85_vm1, %v1449_v4 }
  0x41   :  { %1424 = vmatpush3.bf16.msra.mxu0 %v990_v9  ;;  %1425 = vmatprep.mubr.msk.bf16.mxu0 %vm1454_vm0, %v1453_v0 }
  0x43   :  { %1420 = vmatmul.mubr.msk.bf16.vlgmr.msra.gmra.mrb[24].mxu1 %vm85_vm1, %v1450_v10 }
  0x44   :  { %1430 = vmatpush3.bf16.msra.mxu1 %v1053_v11  ;;  %1431 = vmatprep.mubr.msk.bf16.mxu1 %vm1454_vm0, %v1453_v0 }
  0x48   :  { %1426 = vmatmul.mubr.msk.bf16.vlgmr.msra.gmra.mrb[28].mxu0 %vm85_vm1, %v1451_v12 }
  0x4b   :  { %1432 = vmatmul.mubr.msk.bf16.vlgmr.msra.gmra.mrb[28].mxu1 %vm85_vm1, %v1452_v15 }
  0xe3   :  { %v123_v16 = vpop.f32.mrb[0].mxu0 }
  0xe4   :  { %v1343_v17 = vpop.f32.mrb[1].mxu0 }
  0xe5   :  { %v126_v35 = vpop.f32.mrb[2].mxu0 }
  0xe6   :  { %v172_v36 = vpop.f32.mrb[0].mxu1  ;;  %v1344_v18 = vpop.f32.mrb[3].mxu0 }
  0xe7   :  { %v173_v19 = vadd.f32 %v172_v36, %v123_v16  ;;  %v1349_v20 = vpop.f32.mrb[1].mxu1 }
  0xe8   :  { %v175_v23 = vpop.f32.mrb[2].mxu1 }
  0xe9   :  { %v176_v25 = vadd.f32 %v175_v23, %v126_v35  ;;  %v1350_v26 = vpop.f32.mrb[3].mxu1 }
  0xeb   :  { %v229_v27 = vpop.f32.mrb[4].mxu0 }
  0xec   :  { %v236_v0 = vadd.f32 %v229_v27, %v173_v19  ;;  %v238_v29 = vsub.f32 0.0, %v229_v27  ;;  %v1355_v30 = vpop.f32.mrb[5].mxu0 }
  0xed   :  { %v232_v31 = vpop.f32.mrb[6].mxu0 }
  0xee   :  { %v240_v32 = vadd.f32 %v238_v29, %v123_v16  ;;  %v237_v33 = vadd.f32 %v232_v31, %v176_v25  ;;  %v239_v34 = vsub.f32 0.0, %v232_v31  ;;  %v292_v37 = vpop.f32.mrb[4].mxu1  ;;  %v1356_v38 = vpop.f32.mrb[7].mxu0 }
  0xef   :  { %v299_v39 = vsub.f32 0.0, %v292_v37  ;;  %v1361_v40 = vpop.f32.mrb[5].mxu1 }
  0xf0   :  { %v241_v41 = vadd.f32 %v239_v34, %v126_v35  ;;  %v295_v42 = vpop.f32.mrb[6].mxu1 }
  0xf1   :  { %v301_v43 = vadd.f32 %v299_v39, %v240_v32  ;;  %v300_v44 = vsub.f32 0.0, %v295_v42  ;;  %v1362_v45 = vpop.f32.mrb[7].mxu1 }
  0xf3   :  { %v302_v46 = vadd.f32 %v300_v44, %v241_v41  ;;  %v387_v47 = vpop.f32.mrb[8].mxu0 }
  0xf4   :  { %v1367_v48 = vpop.f32.mrb[9].mxu0 }
  0xf5   :  { %v390_v49 = vpop.f32.mrb[10].mxu0 }
  0xf6   :  { %v436_v60 = vpop.f32.mrb[8].mxu1  ;;  %v1368_v51 = vpop.f32.mrb[11].mxu0 }
  0xf7   :  { %v437_v52 = vadd.f32 %v436_v60, %v387_v47  ;;  %v1373_v53 = vpop.f32.mrb[9].mxu1 }
  0xf8   :  { %v439_v54 = vpop.f32.mrb[10].mxu1 }
  0xf9   :  { %v440_v63 = vadd.f32 %v439_v54, %v390_v49  ;;  %v1374_v13 = vpop.f32.mrb[11].mxu1 }
  0xfb   :  { %v493_v55 = vpop.f32.mrb[12].mxu0 }
  0xfc   :  { %v500_v57 = vadd.f32 %v493_v55, %v437_v52  ;;  %v502_v50 = vsub.f32 0.0, %v493_v55  ;;  %v1379_v56 = vpop.f32.mrb[13].mxu0 }
  0xfd   :  { %v496_v58 = vpop.f32.mrb[14].mxu0 }
  0xfe   :  { %v504_v1 = vadd.f32 %v502_v50, %v387_v47  ;;  %v567_v8 = vadd.f32 %v500_v57, %v236_v0  ;;  %v501_v59 = vadd.f32 %v496_v58, %v440_v63  ;;  %v503_v61 = vsub.f32 0.0, %v496_v58  ;;  %v556_v14 = vpop.f32.mrb[12].mxu1  ;;  %v1380_v62 = vpop.f32.mrb[15].mxu0 }
  0xff   :  { %v563_v2 = vsub.f32 0.0, %v556_v14  ;;  %v1385_v3 = vpop.f32.mrb[13].mxu1 }
 0x100   :  { %v505_v6 = vadd.f32 %v503_v61, %v390_v49  ;;  %v568_v7 = vadd.f32 %v501_v59, %v237_v33  ;;  %v559_v21 = vpop.f32.mrb[14].mxu1 }
 0x101   :  { %v565_v24 = vadd.f32 %v563_v2, %v504_v1  ;;  %v564_v28 = vsub.f32 0.0, %v559_v21  ;;  %v1386_v4 = vpop.f32.mrb[15].mxu1 }
 0x103   :  { %v569_v22 = vadd.f32 %v565_v24, %v301_v43  ;;  %v566_v5 = vadd.f32 %v564_v28, %v505_v6  ;;  %v643_v9 = vpop.f32.mrb[16].mxu0 }
 0x104   :  { %v1391_v10 = vpop.f32.mrb[17].mxu0 }
 0x105   :  { %v570_v11 = vadd.f32 %v566_v5, %v302_v46  ;;  %v646_v12 = vpop.f32.mrb[18].mxu0 }
 0x106   :  { %v692_v15 = vpop.f32.mrb[16].mxu1  ;;  %v1392_v16 = vpop.f32.mrb[19].mxu0 }
 0x107   :  { %v693_v17 = vadd.f32 %v692_v15, %v643_v9  ;;  %v1397_v35 = vpop.f32.mrb[17].mxu1 }
 0x108   :  { %v695_v36 = vpop.f32.mrb[18].mxu1 }
 0x109   :  { %v696_v18 = vadd.f32 %v695_v36, %v646_v12  ;;  %v1398_v19 = vpop.f32.mrb[19].mxu1 }
 0x10b   :  { %v749_v20 = vpop.f32.mrb[20].mxu0 }
 0x10c   :  { %v756_v23 = vadd.f32 %v749_v20, %v693_v17  ;;  %v758_v25 = vsub.f32 0.0, %v749_v20  ;;  %v1403_v26 = vpop.f32.mrb[21].mxu0 }
 0x10d   :  { %v752_v27 = vpop.f32.mrb[22].mxu0 }
 0x10e   :  { %v760_v0 = vadd.f32 %v758_v25, %v643_v9  ;;  %v823_v29 = vadd.f32 %v756_v23, %v567_v8  ;;  %v827_v30 = vsub.f32 0.0, %v756_v23  ;;  %v757_v31 = vadd.f32 %v752_v27, %v696_v18  ;;  %v812_v32 = vpop.f32.mrb[20].mxu1  ;;  %v1404_v33 = vpop.f32.mrb[23].mxu0 }
 0x10f   :  { %v759_v34 = vsub.f32 0.0, %v752_v27  ;;  %v819_v37 = vsub.f32 0.0, %v812_v32  ;;  %v1409_v38 = vpop.f32.mrb[21].mxu1 }
 0x110   :  { %v829_v39 = vadd.f32 %v827_v30, %v500_v57  ;;  %1115 = vst [vmem:[%s1741_s2] sm:$0xff] %v823_v29  ;;  %v824_v40 = vadd.f32 %v757_v31, %v568_v7  ;;  %v828_v41 = vsub.f32 0.0, %v757_v31  ;;  %v815_v42 = vpop.f32.mrb[22].mxu1 }
 0x111   :  { %v761_v43 = vadd.f32 %v759_v34, %v646_v12  ;;  %v821_v44 = vadd.f32 %v819_v37, %v760_v0  ;;  %v820_v45 = vsub.f32 0.0, %v815_v42  ;;  %v1410_v46 = vpop.f32.mrb[23].mxu1 }
 0x112   :  { %v830_v47 = vadd.f32 %v828_v41, %v501_v59  ;;  %1116 = vst [vmem:[%s1741_s2 + $0x8] sm:$0xff] %v824_v40 }
 0x113   :  { %v825_v48 = vadd.f32 %v821_v44, %v569_v22  ;;  %v831_v49 = vsub.f32 0.0, %v821_v44  ;;  %v822_v60 = vadd.f32 %v820_v45, %v761_v43  ;;  %v927_v51 = vpop.f32.mrb[24].mxu0 }
 0x114   :  { %v1415_v52 = vpop.f32.mrb[25].mxu0 }
 0x115   :  { %v833_v53 = vadd.f32 %v831_v49, %v565_v24  ;;  %1222 = vst [vmem:[%s1741_s2 + $0x10] sm:$0xff] %v825_v48  ;;  %v826_v54 = vadd.f32 %v822_v60, %v570_v11  ;;  %v832_v63 = vsub.f32 0.0, %v822_v60  ;;  %v930_v13 = vpop.f32.mrb[26].mxu0 }
 0x116   :  { %v976_v55 = vpop.f32.mrb[24].mxu1  ;;  %v1416_v57 = vpop.f32.mrb[27].mxu0 }
 0x117   :  { %v834_v50 = vadd.f32 %v832_v63, %v566_v5  ;;  %1223 = vst [vmem:[%s1741_s2 + $0x18] sm:$0xff] %v826_v54  ;;  %v977_v56 = vadd.f32 %v976_v55, %v927_v51  ;;  %v1421_v58 = vpop.f32.mrb[25].mxu1 }
 0x118   :  { %v979_v1 = vpop.f32.mrb[26].mxu1 }
 0x119   :  { %v980_v8 = vadd.f32 %v979_v1, %v930_v13  ;;  %v1422_v59 = vpop.f32.mrb[27].mxu1 }
 0x11b   :  { %v1033_v61 = vpop.f32.mrb[28].mxu0 }
 0x11c   :  { %v1040_v14 = vadd.f32 %v1033_v61, %v977_v56  ;;  %v1042_v62 = vsub.f32 0.0, %v1033_v61  ;;  %v1427_v2 = vpop.f32.mrb[29].mxu0 }
 0x11d   :  { %v1036_v3 = vpop.f32.mrb[30].mxu0 }
 0x11e   :  { %v1044_v6 = vadd.f32 %v1042_v62, %v927_v51  ;;  %v1107_v7 = vsub.f32 0.0, %v1040_v14  ;;  %v1041_v21 = vadd.f32 %v1036_v3, %v980_v8  ;;  %v1043_v24 = vsub.f32 0.0, %v1036_v3  ;;  %v1096_v28 = vpop.f32.mrb[28].mxu1  ;;  %v1428_v4 = vpop.f32.mrb[31].mxu0 }
 0x11f   :  { %v1103_v22 = vsub.f32 0.0, %v1096_v28  ;;  %v1433_v5 = vpop.f32.mrb[29].mxu1 }
 0x120   :  { %v1109_v9 = vadd.f32 %v1107_v7, %v829_v39  ;;  %v1045_v10 = vadd.f32 %v1043_v24, %v930_v13  ;;  %v1108_v11 = vsub.f32 0.0, %v1041_v21  ;;  %v1099_v12 = vpop.f32.mrb[30].mxu1 }
 0x121   :  { %v1105_v15 = vadd.f32 %v1103_v22, %v1044_v6  ;;  %v1104_v16 = vsub.f32 0.0, %v1099_v12  ;;  %v1434_v17 = vpop.f32.mrb[31].mxu1 }
 0x122   :  { %1224 = vst [vmem:[%s1741_s2 + $0x20] sm:$0xff] %v1109_v9  ;;  %v1110_v35 = vadd.f32 %v1108_v11, %v830_v47 }
 0x123   :  { %v1111_v36 = vsub.f32 0.0, %v1105_v15  ;;  %v1106_v18 = vadd.f32 %v1104_v16, %v1045_v10 }
 0x124   :  { %1225 = vst [vmem:[%s1741_s2 + $0x28] sm:$0xff] %v1110_v35 }
 0x125   :  { %v1113_v19 = vadd.f32 %v1111_v36, %v833_v53  ;;  %v1112_v20 = vsub.f32 0.0, %v1106_v18 }
 0x127   :  { %1226 = vst [vmem:[%s1741_s2 + $0x30] sm:$0xff] %v1113_v19  ;;  %v1114_v23 = vadd.f32 %v1112_v20, %v834_v50 }
 0x129   :  { %1227 = vst [vmem:[%s1741_s2 + $0x38] sm:$0xff] %v1114_v23 }

</bundles_post_ra>
